<compile_context>
chip_gen: v7x
topology: tpu7x:2x2x1
jax: 0.10.0
libtpu: 0.0.40
codegen_flags: <defaults>
</compile_context>

<pallas_src>
import jax
import jax.numpy as jnp
from jax.experimental import pallas as pl
from jax.experimental.pallas import tpu as pltpu


def _hvac_reward_kernel(action_ref, nxt_ref, w_air_ref, w_pen_ref, w_abs_ref,
                        temp_low_ref, temp_up_ref, mid_ref, out_ref):
    R = w_air_ref.shape[-1]

    # In-kernel casts: DMA inputs in their native dtype, upcast here.
    action = action_ref[...].astype(jnp.float32)       # (TB, R)
    temp = nxt_ref[:, :R].astype(jnp.float32)          # (TB, R) == next_state[..., :-1]

    w_air = w_air_ref[...]                              # (1, R)  is_room*air_max*cost_air
    w_pen = w_pen_ref[...]                              # (1, R)  is_room*penalty
    w_abs = w_abs_ref[...]                              # (1, R)  10*is_room
    low = temp_low_ref[...]                             # (1, R)
    up = temp_up_ref[...]                               # (1, R)
    mid = mid_ref[...]                                  # (1, R)  (up+low)/2

    oob = jnp.logical_or(temp < low, temp > up)
    cost = (action * w_air
            + jnp.where(oob, w_pen, 0.0)
            + w_abs * jnp.abs(mid - temp))
    reward = -jnp.sum(cost, axis=-1)                    # (TB,)
    # Lane-dense output: one (1, TB) row per grid step.
    out_ref[...] = reward.reshape(1, -1)


def hvac_reward(state, action, next_state, params, *, batch_tile=1024):
    """Pallas equivalent of HVACReward.forward.

    state:      (B, R+1)  (unused; kept for signature parity)
    action:     (B, R)
    next_state: (B, R+1)
    params:     dict with air_max, is_room, cost_air, temp_low, temp_up (each (R,))
                and penalty (scalar).
    returns:    (B,) float32 reward
    """
    del state  # not used by the reward function
    B, R = action.shape
    assert next_state.shape[-1] == R + 1

    f32 = jnp.float32
    air_max = jnp.asarray(params["air_max"], f32).reshape(1, R)
    is_room = jnp.asarray(params["is_room"], f32).reshape(1, R)
    cost_air = jnp.asarray(params["cost_air"], f32).reshape(1, R)
    temp_low = jnp.asarray(params["temp_low"], f32).reshape(1, R)
    temp_up = jnp.asarray(params["temp_up"], f32).reshape(1, R)
    penalty = jnp.asarray(params["penalty"], f32)

    # One-time O(R) constant folding (not a per-batch wrapper pass).
    w_air = is_room * air_max * cost_air
    w_pen = is_room * penalty
    w_abs = 10.0 * is_room
    mid = (temp_up + temp_low) / 2.0

    TB = min(B, batch_tile)
    nb = pl.cdiv(B, TB)
    B_pad = nb * TB
    if B_pad != B:
        pad = B_pad - B
        action = jnp.pad(action, ((0, pad), (0, 0)))
        next_state = jnp.pad(next_state, ((0, pad), (0, 0)))

    batch_act_spec = pl.BlockSpec((TB, R), lambda i: (i, 0))
    batch_nxt_spec = pl.BlockSpec((TB, R + 1), lambda i: (i, 0))
    param_spec = pl.BlockSpec((1, R), lambda i: (0, 0))
    out_spec = pl.BlockSpec((1, TB), lambda i: (i, 0))

    out = pl.pallas_call(
        _hvac_reward_kernel,
        out_shape=jax.ShapeDtypeStruct((nb, TB), jnp.float32),
        grid_spec=pltpu.PrefetchScalarGridSpec(
            num_scalar_prefetch=0,
            grid=(nb,),
            in_specs=[batch_act_spec, batch_nxt_spec,
                      param_spec, param_spec, param_spec,
                      param_spec, param_spec, param_spec],
            out_specs=out_spec,
        ),
        compiler_params=pltpu.CompilerParams(
            dimension_semantics=("parallel",)),
    )(action, next_state, w_air, w_pen, w_abs, temp_low, temp_up, mid)
    return out.reshape(B_pad)[:B]


def _reference(action, next_state, params):
    """Pure-JAX reference matching the PyTorch forward exactly."""
    action = action.astype(jnp.float32)
    air = action * params["air_max"]
    temp = next_state[..., :-1].astype(jnp.float32)
    low, up = params["temp_low"], params["temp_up"]
    oob = jnp.logical_or(temp < low, temp > up).astype(jnp.float32)
    cost = (air * params["cost_air"]
            + oob * params["penalty"]
            + 10.0 * jnp.abs((up + low) / 2.0 - temp))
    return -(params["is_room"].astype(jnp.float32) * cost).sum(axis=-1)


if __name__ == "__main__":
    key = jax.random.PRNGKey(0)
    R = 16  # number of rooms (state has R+1 features: temps + time)

    # Deterministic synthetic HVAC config (shapes match HVACReward.__init__).
    params = {
        "air_max": jnp.full((R,), 10.0, jnp.float32),
        "is_room": (jnp.arange(R) % 2 == 0),                 # alternate rooms/hallways
        "cost_air": jnp.full((R,), 1.0, jnp.float32),
        "temp_low": jnp.full((R,), 20.0, jnp.float32),
        "temp_up": jnp.full((R,), 23.5, jnp.float32),
        "penalty": jnp.float32(20000.0),
    }

    # Test 1: plain batch (single grid step, blocks == full dims).
    B = 8
    k1, k2, k3 = jax.random.split(key, 3)
    state = jax.random.normal(k1, (B, R + 1), jnp.float32) * 2.0 + 21.0
    action = jax.random.uniform(k2, (B, R), jnp.float32)
    next_state = jax.random.normal(k3, (B, R + 1), jnp.float32) * 3.0 + 21.0

    reward = jax.block_until_ready(hvac_reward(state, action, next_state, params))
    expected = _reference(action, next_state, params)
    assert reward.shape == (B,)
    assert jnp.allclose(reward, expected, rtol=1e-5, atol=1e-3), (reward, expected)

    # Test 2: batch not divisible by the tile (exercises cdiv + padding + multi-step grid).
    B2 = 10
    k4, k5, k6 = jax.random.split(jax.random.PRNGKey(1), 3)
    state2 = jax.random.normal(k4, (B2, R + 1), jnp.float32) * 2.0 + 21.0
    action2 = jax.random.uniform(k5, (B2, R), jnp.float32)
    next_state2 = jax.random.normal(k6, (B2, R + 1), jnp.float32) * 3.0 + 21.0

    reward2 = jax.block_until_ready(
        hvac_reward(state2, action2, next_state2, params, batch_tile=8))
    expected2 = _reference(action2, next_state2, params)
    assert reward2.shape == (B2,)
    assert jnp.allclose(reward2, expected2, rtol=1e-5, atol=1e-3), (reward2, expected2)

    print("KERNEL_OK")
</pallas_src>

<mosaic_0001>
module attributes {stable_mosaic.version = 11 : i64} {
  func.func @_hvac_reward_kernel(%arg0: i32, %arg1: memref<8x16xf32, #tpu.memory_space<vmem>>, %arg2: memref<8x17xf32, #tpu.memory_space<vmem>>, %arg3: memref<1x16xf32, #tpu.memory_space<vmem>>, %arg4: memref<1x16xf32, #tpu.memory_space<vmem>>, %arg5: memref<1x16xf32, #tpu.memory_space<vmem>>, %arg6: memref<1x16xf32, #tpu.memory_space<vmem>>, %arg7: memref<1x16xf32, #tpu.memory_space<vmem>>, %arg8: memref<1x16xf32, #tpu.memory_space<vmem>>, %arg9: memref<1x8xf32, #tpu.memory_space<vmem>>) attributes {dimension_semantics = [#tpu.dimension_semantics<parallel>], iteration_bounds = array<i64: 1>, scalar_prefetch = 0 : i64, scratch_operands = 0 : i64, tpu.core_type = #tpu.core_type<tc>, window_params = [{transform_indices = @transform_0, window_bounds = array<i64: 8, 16>}, {transform_indices = @transform_1, window_bounds = array<i64: 8, 17>}, {pipeline_mode = #tpu.pipeline_mode<synchronous>, transform_indices = @transform_2, window_bounds = array<i64: 1, 16>}, {pipeline_mode = #tpu.pipeline_mode<synchronous>, transform_indices = @transform_3, window_bounds = array<i64: 1, 16>}, {pipeline_mode = #tpu.pipeline_mode<synchronous>, transform_indices = @transform_4, window_bounds = array<i64: 1, 16>}, {pipeline_mode = #tpu.pipeline_mode<synchronous>, transform_indices = @transform_5, window_bounds = array<i64: 1, 16>}, {pipeline_mode = #tpu.pipeline_mode<synchronous>, transform_indices = @transform_6, window_bounds = array<i64: 1, 16>}, {pipeline_mode = #tpu.pipeline_mode<synchronous>, transform_indices = @transform_7, window_bounds = array<i64: 1, 16>}, {transform_indices = @transform_8, window_bounds = array<i64: 1, 8>}]} {
    %c0 = arith.constant 0 : index
    %c0_0 = arith.constant 0 : index
    %0 = vector.load %arg1[%c0, %c0_0] : memref<8x16xf32, #tpu.memory_space<vmem>>, vector<8x16xf32>
    %c0_1 = arith.constant 0 : index
    %c0_2 = arith.constant 0 : index
    %1 = vector.load %arg2[%c0_1, %c0_2] : memref<8x17xf32, #tpu.memory_space<vmem>>, vector<8x16xf32>
    %c0_3 = arith.constant 0 : index
    %c0_4 = arith.constant 0 : index
    %2 = vector.load %arg3[%c0_3, %c0_4] : memref<1x16xf32, #tpu.memory_space<vmem>>, vector<1x16xf32>
    %c0_5 = arith.constant 0 : index
    %c0_6 = arith.constant 0 : index
    %3 = vector.load %arg4[%c0_5, %c0_6] : memref<1x16xf32, #tpu.memory_space<vmem>>, vector<1x16xf32>
    %c0_7 = arith.constant 0 : index
    %c0_8 = arith.constant 0 : index
    %4 = vector.load %arg5[%c0_7, %c0_8] : memref<1x16xf32, #tpu.memory_space<vmem>>, vector<1x16xf32>
    %c0_9 = arith.constant 0 : index
    %c0_10 = arith.constant 0 : index
    %5 = vector.load %arg6[%c0_9, %c0_10] : memref<1x16xf32, #tpu.memory_space<vmem>>, vector<1x16xf32>
    %c0_11 = arith.constant 0 : index
    %c0_12 = arith.constant 0 : index
    %6 = vector.load %arg7[%c0_11, %c0_12] : memref<1x16xf32, #tpu.memory_space<vmem>>, vector<1x16xf32>
    %c0_13 = arith.constant 0 : index
    %c0_14 = arith.constant 0 : index
    %7 = vector.load %arg8[%c0_13, %c0_14] : memref<1x16xf32, #tpu.memory_space<vmem>>, vector<1x16xf32>
    %8 = vector.broadcast %5 : vector<1x16xf32> to vector<8x16xf32>
    %9 = arith.cmpf olt, %1, %8 : vector<8x16xf32>
    %10 = vector.broadcast %6 : vector<1x16xf32> to vector<8x16xf32>
    %11 = arith.cmpf ogt, %1, %10 : vector<8x16xf32>
    %12 = arith.ori %9, %11 : vector<8x16xi1>
    %13 = vector.broadcast %2 : vector<1x16xf32> to vector<8x16xf32>
    %14 = arith.mulf %0, %13 : vector<8x16xf32>
    %cst = arith.constant 0.000000e+00 : f32
    %15 = vector.shape_cast %3 : vector<1x16xf32> to vector<1x16xf32>
    %16 = vector.broadcast %15 : vector<1x16xf32> to vector<8x16xf32>
    %17 = vector.broadcast %cst : f32 to vector<8x16xf32>
    %18 = arith.select %12, %16, %17 : vector<8x16xi1>, vector<8x16xf32>
    %19 = arith.addf %14, %18 : vector<8x16xf32>
    %20 = vector.broadcast %7 : vector<1x16xf32> to vector<8x16xf32>
    %21 = arith.subf %20, %1 : vector<8x16xf32>
    %22 = math.absf %21 : vector<8x16xf32>
    %23 = vector.broadcast %4 : vector<1x16xf32> to vector<8x16xf32>
    %24 = arith.mulf %23, %22 : vector<8x16xf32>
    %25 = arith.addf %19, %24 : vector<8x16xf32>
    %cst_15 = arith.constant dense<0.000000e+00> : vector<8xf32>
    %26 = vector.multi_reduction <add>, %25, %cst_15 [1] : vector<8x16xf32> to vector<8xf32>
    %cst_16 = arith.constant 0.000000e+00 : f32
    %27 = vector.broadcast %cst_16 : f32 to vector<8xf32>
    %28 = arith.subf %27, %26 : vector<8xf32>
    %29 = vector.shape_cast %28 : vector<8xf32> to vector<1x8xf32>
    %c0_17 = arith.constant 0 : index
    %c0_18 = arith.constant 0 : index
    %30 = vector.load %arg9[%c0_17, %c0_18] : memref<1x8xf32, #tpu.memory_space<vmem>>, vector<1x8xf32>
    tpu.vector_store %arg9[%c0_17, %c0_18], %29 {strides = array<i32>} : memref<1x8xf32, #tpu.memory_space<vmem>>, vector<1x8xf32>,
    return
  }
  func.func @transform_0(%arg0: i32) -> (i32, i32) {
    %c0_i32 = arith.constant 0 : i32
    %c0_i32_0 = arith.constant 0 : i32
    return %arg0, %c0_i32 : i32, i32
  }
  func.func @transform_1(%arg0: i32) -> (i32, i32) {
    %c0_i32 = arith.constant 0 : i32
    %c0_i32_0 = arith.constant 0 : i32
    return %arg0, %c0_i32 : i32, i32
  }
  func.func @transform_2(%arg0: i32) -> (i32, i32) {
    %c0_i32 = arith.constant 0 : i32
    %c0_i32_0 = arith.constant 0 : i32
    %c0_i32_1 = arith.constant 0 : i32
    return %c0_i32, %c0_i32_0 : i32, i32
  }
  func.func @transform_3(%arg0: i32) -> (i32, i32) {
    %c0_i32 = arith.constant 0 : i32
    %c0_i32_0 = arith.constant 0 : i32
    %c0_i32_1 = arith.constant 0 : i32
    return %c0_i32, %c0_i32_0 : i32, i32
  }
  func.func @transform_4(%arg0: i32) -> (i32, i32) {
    %c0_i32 = arith.constant 0 : i32
    %c0_i32_0 = arith.constant 0 : i32
    %c0_i32_1 = arith.constant 0 : i32
    return %c0_i32, %c0_i32_0 : i32, i32
  }
  func.func @transform_5(%arg0: i32) -> (i32, i32) {
    %c0_i32 = arith.constant 0 : i32
    %c0_i32_0 = arith.constant 0 : i32
    %c0_i32_1 = arith.constant 0 : i32
    return %c0_i32, %c0_i32_0 : i32, i32
  }
  func.func @transform_6(%arg0: i32) -> (i32, i32) {
    %c0_i32 = arith.constant 0 : i32
    %c0_i32_0 = arith.constant 0 : i32
    %c0_i32_1 = arith.constant 0 : i32
    return %c0_i32, %c0_i32_0 : i32, i32
  }
  func.func @transform_7(%arg0: i32) -> (i32, i32) {
    %c0_i32 = arith.constant 0 : i32
    %c0_i32_0 = arith.constant 0 : i32
    %c0_i32_1 = arith.constant 0 : i32
    return %c0_i32, %c0_i32_0 : i32, i32
  }
  func.func @transform_8(%arg0: i32) -> (i32, i32) {
    %c0_i32 = arith.constant 0 : i32
    %c0_i32_0 = arith.constant 0 : i32
    return %arg0, %c0_i32 : i32, i32
  }
}

</mosaic_0001>

<bundles_post_ra>
// kernel: tpu_custom_call.1
= control target key start
LH: loop header
LB: loop body
LE: loop exit
PB: predicated region body
PF: predicated region fallthrough
CT: control target
= control target key end

     0   :  { %13 = vsyncpa [#allocation3], 0  ;;  %s322_s0 = inlined_call_operand.hbm [shape: f32[8,16], index: 0, kind: input, shape index: {}]   ;;  %s323_s1 = inlined_call_operand.hbm [shape: f32[8,17], index: 1, kind: input, shape index: {}]   ;;  %s324_s2 = inlined_call_operand.vmem [shape: f32[1,16], index: 2, kind: input, shape index: {}]   ;;  %s325_s3 = inlined_call_operand.vmem [shape: f32[1,16], index: 3, kind: input, shape index: {}]   ;;  %s326_s4 = inlined_call_operand.vmem [shape: f32[1,16], index: 4, kind: input, shape index: {}]   ;;  %s327_s5 = inlined_call_operand.vmem [shape: f32[1,16], index: 5, kind: input, shape index: {}]   ;;  %s328_s6 = inlined_call_operand.vmem [shape: f32[1,16], index: 6, kind: input, shape index: {}]   ;;  %s329_s7 = inlined_call_operand.vmem [shape: f32[1,16], index: 7, kind: input, shape index: {}]   ;;  %s330_s8 = inlined_call_operand.hbm [shape: f32[1,8], index: 8, kind: output, shape index: {}]  }
   0x1   :  { %14 = vsyncpa [#allocation6], 0 }
   0x2   :  { %15 = vsyncpa [#allocation4], 0  ;;  %s220_s27 = smov [#allocation2]   ;;  %s221_s29 = smov [#allocation5]  }
   0x3   :  { %s22_s28 = sshll.u32 %s220_s27, 4  ;;  %s32_s30 = sshll.u32 %s221_s29, 4  ;;  %s23_s28 = int_to_ptr.vmem [resolvable:$true] %s22_s28  ;;  %s33_s30 = int_to_ptr.vmem [resolvable:$true] %s32_s30 }
   0x4   :  { %s148_s11 = scalar_lea.hbm %s322_s0, 128 }
   0x5   :  { %p149_p0 = scmp.ne.s32.totalorder %s322_s0, %s148_s11  ;;  %p152_p1 = scmp.lt.u32.totalorder %s148_s11, %s322_s0 }
   0x7   :  { %p154_p2 = pnand %p152_p1, %p149_p0 }
   0x9   :  { %157 = shalt.err (!%p154_p2)
}
   0xa   :  { %s158_s16 = scalar_lea.vmem %s23_s28, 128  ;;  %p163_p4 = scmp.lt.s32.totalorder %s23_s28, %s23_s28 }
   0xb   :  { %p159_p3 = scmp.ne.s32.totalorder %s23_s28, %s158_s16  ;;  %p164_p5 = scmp.lt.s32.totalorder %s158_s16, %s158_s16 }
   0xd   :  { %p165_p6 = por %p164_p5, %p163_p4 }
   0xf   :  { %p166_p7 = pnand %p165_p6, %p159_p3 }
  0x11   :  { %169 = shalt.err (!%p166_p7)
}
  0x12   :  { %25 = dma.hbm_to_vmem [thread:$0]  %s322_s0, 128, %s23_s28, [#allocation3]  }
  0x13   :  { %s170_s21 = scalar_lea.hbm %s323_s1, 128 }
  0x14   :  { %p171_p8 = scmp.ne.s32.totalorder %s323_s1, %s170_s21  ;;  %p174_p9 = scmp.lt.u32.totalorder %s170_s21, %s323_s1 }
  0x16   :  { %p176_p10 = pnand %p174_p9, %p171_p8 }
  0x18   :  { %179 = shalt.err (!%p176_p10)
}
  0x19   :  { %s180_s26 = scalar_lea.vmem %s33_s30, 128  ;;  %p185_p12 = scmp.lt.s32.totalorder %s33_s30, %s33_s30 }
  0x1a   :  { %p181_p11 = scmp.ne.s32.totalorder %s33_s30, %s180_s26  ;;  %p186_p13 = scmp.lt.s32.totalorder %s180_s26, %s180_s26 }
  0x1c   :  { %p187_p0 = por %p186_p13, %p185_p12 }
  0x1e   :  { %p188_p1 = pnand %p187_p0, %p181_p11 }
  0x20   :  { %191 = shalt.err (!%p188_p1)
}
  0x21   :  { %35 = dma.hbm_to_vmem [thread:$0]  %s323_s1, 128, %s33_s30, [#allocation6]  }
  0x22   :  { %214 = dma.done.wait [#allocation3], 128  }
  0x23   :  { %215 = vsyncadd [#allocation3], 4294967168 }
  0x24   :  { %216 = dma.done.wait [#allocation6], 128  }
  0x25   :  { %217 = vsyncadd [#allocation6], 4294967168  ;;  %v54_v0 = vld [vmem:[#allocation2] sm:$0xff]  ;;  %v55_v1 = vld [vmem:[#allocation5] sm:$0xff]  ;;  %vm108_vm3 = vcmask 130048   ;;  %v114_v16 = vlaneseq  ;;  %vm121_vm4 = vcmask 57344  }
  0x26   :  { %v141_v2 = vld [vmem:[%s324_s2] ss:$0 sm:$0xff] }
  0x27   :  { %v139_v3 = vld [vmem:[%s327_s5] ss:$0 sm:$0xff]  ;;  %v83_v7 = vmul.f32 %v141_v2, %v54_v0  ;;  %v115_v17 = vand.u32 127, %v114_v16  ;;  %v117_v18 = vshrl.u32 %v114_v16, 7 }
  0x28   :  { %v142_v4 = vld [vmem:[%s325_s3] ss:$0 sm:$0xff]  ;;  %vm68_vm0 = vcmp.lt.f32.partialorder %v55_v1, %v139_v3  ;;  %s222_s3 = smov [#allocation7]  }
  0x29   :  { %v140_v5 = vld [vmem:[%s328_s6] ss:$0 sm:$0xff]  ;;  %v118_v19 = vsub.s32 %v115_v17, %v117_v18  ;;  %s129_s5 = sshll.u32 %s222_s3, 4  ;;  %s130_s5 = int_to_ptr.vmem [resolvable:$true] %s129_s5 }
  0x2a   :  { %v143_v6 = vld [vmem:[%s329_s7] ss:$0 sm:$0xff]  ;;  %vm75_vm1 = vcmp.gt.f32.partialorder %v55_v1, %v140_v5  ;;  %s196_s6 = scalar_lea.vmem %s130_s5, 32  ;;  %p197_p3 = scmp.lt.s32.totalorder %s130_s5, %s130_s5 }
  0x2b   :  { %v98_v8 = vsub.f32 %v143_v6, %v55_v1  ;;  %v144_v9 = vld [vmem:[%s326_s4] ss:$0 sm:$0xff]  ;;  %vm76_vm2 = vmor %vm68_vm0, %vm75_vm1  ;;  %s192_s4 = scalar_lea.vmem %s130_s5, 16 }
  0x2c   :  { %v90_v10 = vsel %vm76_vm2, %v142_v4, 0.0  ;;  %p193_p2 = scmp.ne.s32.totalorder %s130_s5, %s192_s4  ;;  %p198_p4 = scmp.lt.s32.totalorder %s196_s6, %s192_s4 }
  0x2d   :  { %v99_v11 = vand.u32 2147483647, %v98_v8  ;;  %v91_v12 = vadd.f32 %v90_v10, %v83_v7 }
  0x2e   :  { %p199_p5 = por %p198_p4, %p197_p3 }
  0x2f   :  { %v106_v13 = vmul.f32 %v144_v9, %v99_v11 }
  0x30   :  { %p200_p6 = pnand %p199_p5, %p193_p2 }
  0x31   :  { %v107_v14 = vadd.f32 %v106_v13, %v91_v12 }
  0x33   :  { %v109_v15 = vsel %vm108_vm3, %v107_v14, 0.0 }
  0x34   :  { %110 = vadd.xlane.f32.xlu0 %v109_v15 }
  0xc1   :  { %v111_v20 = vpop.xlane.xlu0 %110 }
  0xc2   :  { %v112_v21 = vsub.f32 0.0, %v111_v20 }
  0xc4   :  { %v119_v22 = vrot.slane %v112_v21, %v118_v19 }
  0xc6   :  { %122 = vst.msk [vmem:[#allocation7] sm:$0x1] %vm121_vm4, %v119_v22 }
  0xc7   :  { %203 = shalt.err (!%p200_p6)
}
  0xc8   :  { %s204_s17 = scalar_lea.hbm %s330_s8, 16 }
  0xc9   :  { %p205_p7 = scmp.ne.s32.totalorder %s330_s8, %s204_s17  ;;  %p208_p8 = scmp.lt.u32.totalorder %s204_s17, %s330_s8 }
  0xcb   :  { %p210_p9 = pnand %p208_p8, %p205_p7 }
  0xcd   :  { %213 = shalt.err (!%p210_p9)
}
  0xce   :  { %132 = dma.vmem_to_hbm [thread:$0]  %s130_s5, 16, %s330_s8, [#allocation4]  }
  0xcf   :  { %218 = dma.done.wait [#allocation4], 16  }
  0xd0   :  { %219 = vsyncadd [#allocation4], 4294967280 }
  0xd1   :  { %136 = vsyncpa [#allocation3], 1 }
  0xd2   :  { %137 = vsyncpa [#allocation6], 1 }
  0xd3   :  { %138 = vsyncpa [#allocation4], 1 }

</bundles_post_ra>
